<compile_context>
chip_gen: v7x
topology: tpu7x:2x2x1
jax: 0.10.0
libtpu: 0.0.40
codegen_flags: <defaults>
</compile_context>

<pallas_src>
import jax
import jax.numpy as jnp
from jax import lax
from jax.experimental import pallas as pl
from jax.experimental.pallas import tpu as pltpu


def _gcn_kernel(x_ref, adj_ref, w_ref, b_ref, o_ref):
    # Whole-batch refs, everything VMEM-resident:
    #   x_ref:   (B, N, Cin)
    #   adj_ref: (B, N, N)
    #   w_ref:   (Cin, Cp)      (Cp = Cout padded to a multiple of 128)
    #   b_ref:   (1, Cp)
    #   o_ref:   (B, N, Cp)
    B, N, Cin = x_ref.shape
    Cp = w_ref.shape[1]

    adj = adj_ref[...]                                         # (B, N, N)

    # d_i^{-1/2} = rsqrt(sum_j adj_ij + 1e-5)  -> (B, N, 1), single EUP op.
    deg = jnp.sum(adj, axis=-1, keepdims=True) + 1e-5
    d_inv_sqrt = lax.rsqrt(deg)                                # (B, N, 1)

    # Fuse the batch into one MXU push: (B*N, Cin) @ (Cin, Cp), f32 accumulate.
    support = jnp.dot(x_ref[...].reshape(B * N, Cin), w_ref[...],
                      preferred_element_type=jnp.float32)      # (B*N, Cp)
    support = support.reshape(B, N, Cp) * d_inv_sqrt           # row scale (lane-dense)

    # D^-1/2 A D^-1/2 (X W)  ==  d * (A @ (d * support)), batched matmul.
    agg = jnp.einsum('bij,bjk->bik', adj, support,
                     preferred_element_type=jnp.float32)       # (B, N, Cp)

    o_ref[...] = agg * d_inv_sqrt + b_ref[...]                 # bias broadcast once


def gcn_forward(x, adj, weight, bias):
    """x: (B, N, Cin), adj: (B, N, N), weight: (Cin, Cout), bias: (Cout,).
    Returns (B, N, Cout) float32, matching the PyTorch GCN.forward."""
    B, N, Cin = x.shape
    Cout = weight.shape[1]

    # Pad the output channel dim to a multiple of 128 so the MXU columns and
    # every output store are full-lane-width (zero-padded W/bias columns keep
    # the first Cout columns bit-identical).
    Cp = ((Cout + 127) // 128) * 128

    x = x.astype(jnp.float32)
    adj = adj.astype(jnp.float32)
    w = jnp.zeros((Cin, Cp), jnp.float32).at[:, :Cout].set(weight.astype(jnp.float32))
    b = jnp.zeros((1, Cp), jnp.float32).at[:, :Cout].set(
        bias.reshape(1, Cout).astype(jnp.float32))

    out_padded = pl.pallas_call(
        _gcn_kernel,
        out_shape=jax.ShapeDtypeStruct((B, N, Cp), jnp.float32),
        in_specs=[
            pl.BlockSpec(memory_space=pltpu.MemorySpace.VMEM),   # x (whole batch)
            pl.BlockSpec(memory_space=pltpu.MemorySpace.VMEM),   # adj
            pl.BlockSpec(memory_space=pltpu.MemorySpace.VMEM),   # W (padded)
            pl.BlockSpec(memory_space=pltpu.MemorySpace.VMEM),   # bias (padded)
        ],
        out_specs=pl.BlockSpec(memory_space=pltpu.MemorySpace.VMEM),
    )(x, adj, w, b)

    return out_padded[:, :, :Cout]


def _reference_gcn(x, adj, weight, bias):
    """Pure-JAX reference following the PyTorch ops exactly (diag matmuls)."""
    deg_inv_sqrt = (jnp.sum(adj, axis=-1) + 1e-5) ** (-0.5)          # (B, N)
    d_mat = jax.vmap(jnp.diag)(deg_inv_sqrt)                          # (B, N, N)
    adj_norm = jnp.matmul(jnp.matmul(d_mat, adj), d_mat)              # (B, N, N)
    support = jnp.matmul(x, weight)                                   # (B, N, Cout)
    return jnp.matmul(adj_norm, support) + bias


if __name__ == "__main__":
    # Small shapes consistent with the module: batch of 2 graphs, 16 nodes,
    # 16 input features -> 32 output features.
    B, N, Cin, Cout = 2, 16, 16, 32

    key = jax.random.PRNGKey(0)
    kx, ka, kw, kb = jax.random.split(key, 4)

    x = jax.random.normal(kx, (B, N, Cin), dtype=jnp.float32)
    # Non-negative adjacency weights (graph-like); degrees well away from zero.
    adj = jax.random.uniform(ka, (B, N, N), jnp.float32, 0.0, 1.0)

    # Xavier-uniform weight init (as in reset_parameters); random bias to
    # exercise the bias-add path (the module inits it to zeros but it is a
    # free parameter).
    bound = jnp.sqrt(6.0 / (Cin + Cout))
    weight = jax.random.uniform(kw, (Cin, Cout), jnp.float32, -bound, bound)
    bias = jax.random.uniform(kb, (Cout,), jnp.float32, -0.1, 0.1)

    out = gcn_forward(x, adj, weight, bias)
    out = jax.block_until_ready(out)

    ref = _reference_gcn(x, adj, weight, bias)
    assert out.shape == (B, N, Cout), out.shape
    max_err = float(jnp.max(jnp.abs(out - ref)))
    assert jnp.allclose(out, ref, atol=1e-4, rtol=1e-4), max_err

    print("KERNEL_OK")
</pallas_src>

<mosaic_0001>
module attributes {stable_mosaic.version = 11 : i64} {
  func.func @_gcn_kernel(%arg0: memref<2x16x16xf32, #tpu.memory_space<vmem>>, %arg1: memref<2x16x16xf32, #tpu.memory_space<vmem>>, %arg2: memref<16x128xf32, #tpu.memory_space<vmem>>, %arg3: memref<1x128xf32, #tpu.memory_space<vmem>>, %arg4: memref<2x16x128xf32, #tpu.memory_space<vmem>>) attributes {dimension_semantics = [], scalar_prefetch = 0 : i64, scratch_operands = 0 : i64, tpu.core_type = #tpu.core_type<tc>} {
    %c0 = arith.constant 0 : index
    %c0_0 = arith.constant 0 : index
    %c0_1 = arith.constant 0 : index
    %0 = vector.load %arg1[%c0, %c0_0, %c0_1] : memref<2x16x16xf32, #tpu.memory_space<vmem>>, vector<2x16x16xf32>
    %cst = arith.constant dense<0.000000e+00> : vector<2x16xf32>
    %1 = vector.multi_reduction <add>, %0, %cst [2] : vector<2x16x16xf32> to vector<2x16xf32>
    %2 = vector.shape_cast %1 : vector<2x16xf32> to vector<2x16x1xf32>
    %cst_2 = arith.constant 9.99999974E-6 : f32
    %3 = vector.broadcast %cst_2 : f32 to vector<2x16x1xf32>
    %4 = arith.addf %2, %3 : vector<2x16x1xf32>
    %5 = math.rsqrt %4 : vector<2x16x1xf32>
    %c0_3 = arith.constant 0 : index
    %c0_4 = arith.constant 0 : index
    %c0_5 = arith.constant 0 : index
    %6 = vector.load %arg0[%c0_3, %c0_4, %c0_5] : memref<2x16x16xf32, #tpu.memory_space<vmem>>, vector<2x16x16xf32>
    %7 = vector.shape_cast %6 : vector<2x16x16xf32> to vector<32x16xf32>
    %c0_6 = arith.constant 0 : index
    %c0_7 = arith.constant 0 : index
    %8 = vector.load %arg2[%c0_6, %c0_7] : memref<16x128xf32, #tpu.memory_space<vmem>>, vector<16x128xf32>
    %cst_8 = arith.constant dense<0.000000e+00> : vector<32x128xf32>
    %9 = tpu.matmul %7, %8, %cst_8 {dimension_numbers = #tpu.dot_dimension_numbers<[1], [0], [0], [1], [0, 0, 1, 1], [], []>} : vector<32x16xf32>, vector<16x128xf32>, vector<32x128xf32> -> vector<32x128xf32>
    %10 = vector.shape_cast %9 : vector<32x128xf32> to vector<2x16x128xf32>
    %11 = vector.broadcast %5 : vector<2x16x1xf32> to vector<2x16x128xf32>
    %12 = arith.mulf %10, %11 : vector<2x16x128xf32>
    "tpu.trace_start"() <{level = 10 : i32, message = "bij,bjk->bik"}> : () -> ()
    %cst_9 = arith.constant dense<0.000000e+00> : vector<2x16x128xf32>
    %13 = tpu.matmul %0, %12, %cst_9 {dimension_numbers = #tpu.dot_dimension_numbers<[2], [1], [1], [2], [0, 0, 0, 1, 1, 2], [0], [0]>} : vector<2x16x16xf32>, vector<2x16x128xf32>, vector<2x16x128xf32> -> vector<2x16x128xf32>
    "tpu.trace_stop"() : () -> ()
    %14 = vector.broadcast %5 : vector<2x16x1xf32> to vector<2x16x128xf32>
    %15 = arith.mulf %13, %14 : vector<2x16x128xf32>
    %c0_10 = arith.constant 0 : index
    %c0_11 = arith.constant 0 : index
    %16 = vector.load %arg3[%c0_10, %c0_11] : memref<1x128xf32, #tpu.memory_space<vmem>>, vector<1x128xf32>
    %17 = vector.shape_cast %16 : vector<1x128xf32> to vector<1x1x128xf32>
    %18 = vector.broadcast %17 : vector<1x1x128xf32> to vector<2x16x128xf32>
    %19 = arith.addf %15, %18 : vector<2x16x128xf32>
    %c0_12 = arith.constant 0 : index
    %c0_13 = arith.constant 0 : index
    %c0_14 = arith.constant 0 : index
    %20 = vector.load %arg4[%c0_12, %c0_13, %c0_14] : memref<2x16x128xf32, #tpu.memory_space<vmem>>, vector<2x16x128xf32>
    tpu.vector_store %arg4[%c0_12, %c0_13, %c0_14], %19 {strides = array<i32>} : memref<2x16x128xf32, #tpu.memory_space<vmem>>, vector<2x16x128xf32>,
    return
  }
}

</mosaic_0001>

<bundles_post_ra>
// kernel: tpu_custom_call.1
= control target key start
LH: loop header
LB: loop body
LE: loop exit
PB: predicated region body
PF: predicated region fallthrough
CT: control target
= control target key end

     0   :  { %9 = vsyncpa [#allocation3], 0  ;;  %s670_s0 = inlined_call_operand.hbm [shape: f32[2,16,16], index: 0, kind: input, shape index: {}]   ;;  %s671_s1 = inlined_call_operand.hbm [shape: f32[2,16,16], index: 1, kind: input, shape index: {}]   ;;  %s672_s2 = inlined_call_operand.hbm [shape: f32[16,128], index: 2, kind: input, shape index: {}]   ;;  %s673_s3 = inlined_call_operand.vmem [shape: f32[1,128], index: 3, kind: input, shape index: {}]   ;;  %s674_s4 = inlined_call_operand.hbm [shape: f32[2,16,128], index: 4, kind: output, shape index: {}]  }
   0x1   :  { %10 = vsyncpa [#allocation6], 0 }
   0x2   :  { %11 = vsyncpa [#allocation4], 0  ;;  %s557_s15 = smov [#allocation5]   ;;  %s558_s17 = smov [#allocation2]  }
   0x3   :  { %s29_s16 = sshll.u32 %s557_s15, 4  ;;  %s17_s18 = sshll.u32 %s558_s17, 4  ;;  %s30_s16 = int_to_ptr.vmem [resolvable:$true] %s29_s16  ;;  %s588_s18 = int_to_ptr.vmem [resolvable:$true] %s17_s18 }
   0x4   :  { %s463_s21 = scalar_lea.hbm %s671_s1, 512 }
   0x5   :  { %p464_p0 = scmp.ne.s32.totalorder %s671_s1, %s463_s21  ;;  %p467_p1 = scmp.lt.u32.totalorder %s463_s21, %s671_s1 }
   0x7   :  { %p469_p2 = pnand %p467_p1, %p464_p0 }
   0x9   :  { %472 = shalt.err (!%p469_p2)
}
   0xa   :  { %s473_s26 = scalar_lea.vmem %s30_s16, 512  ;;  %p478_p4 = scmp.lt.s32.totalorder %s30_s16, %s30_s16 }
   0xb   :  { %p474_p3 = scmp.ne.s32.totalorder %s30_s16, %s473_s26  ;;  %p479_p5 = scmp.lt.s32.totalorder %s473_s26, %s473_s26 }
   0xd   :  { %p480_p6 = por %p479_p5, %p478_p4 }
   0xf   :  { %p481_p7 = pnand %p480_p6, %p474_p3 }
  0x11   :  { %484 = shalt.err (!%p481_p7)
}
  0x12   :  { %s559_s27 = smov 128   ;;  %s560_s28 = smov 8  }
  0x13   :  { %35 = dma.hbm_to_vmem [thread:$0]  %s671_s1, 512, %s30_s16, [#allocation6], %s559_s27, %s559_s27, %s560_s28  }
  0x14   :  { %s485_s7 = scalar_lea.hbm %s670_s0, 512 }
  0x15   :  { %p486_p8 = scmp.ne.s32.totalorder %s670_s0, %s485_s7  ;;  %p489_p9 = scmp.lt.u32.totalorder %s485_s7, %s670_s0 }
  0x17   :  { %p491_p10 = pnand %p489_p9, %p486_p8 }
  0x19   :  { %494 = shalt.err (!%p491_p10)
}
  0x1a   :  { %s495_s12 = scalar_lea.vmem %s588_s18, 512  ;;  %p500_p12 = scmp.lt.s32.totalorder %s588_s18, %s588_s18 }
  0x1b   :  { %p496_p11 = scmp.ne.s32.totalorder %s588_s18, %s495_s12  ;;  %p501_p13 = scmp.lt.s32.totalorder %s495_s12, %s495_s12 }
  0x1d   :  { %p502_p0 = por %p501_p13, %p500_p12 }
  0x1f   :  { %p503_p1 = pnand %p502_p0, %p496_p11 }
  0x21   :  { %506 = shalt.err (!%p503_p1)
}
  0x22   :  { %23 = dma.hbm_to_vmem [thread:$0]  %s670_s0, 512, %s588_s18, [#allocation3], %s559_s27, %s559_s27, %s560_s28  }
  0x23   :  { %s561_s14 = smov [#allocation7]   ;;  %s507_s19 = scalar_lea.hbm %s672_s2, 256 }
  0x24   :  { %s41_s15 = sshll.u32 %s561_s14, 4  ;;  %p508_p2 = scmp.ne.s32.totalorder %s672_s2, %s507_s19  ;;  %s42_s15 = int_to_ptr.vmem [resolvable:$true] %s41_s15 }
  0x25   :  { %p511_p3 = scmp.lt.u32.totalorder %s507_s19, %s672_s2 }
  0x27   :  { %p513_p4 = pnand %p511_p3, %p508_p2 }
  0x29   :  { %516 = shalt.err (!%p513_p4)
}
  0x2a   :  { %s517_s24 = scalar_lea.vmem %s42_s15, 256  ;;  %p522_p6 = scmp.lt.s32.totalorder %s42_s15, %s42_s15 }
  0x2b   :  { %p518_p5 = scmp.ne.s32.totalorder %s42_s15, %s517_s24  ;;  %p523_p7 = scmp.lt.s32.totalorder %s517_s24, %s517_s24 }
  0x2d   :  { %p524_p8 = por %p523_p7, %p522_p6 }
  0x2f   :  { %p525_p9 = pnand %p524_p8, %p518_p5 }
  0x31   :  { %528 = shalt.err (!%p525_p9)
}
  0x32   :  { %47 = dma.hbm_to_vmem [thread:$0]  %s672_s2, 256, %s42_s15, [#allocation6], %s559_s27, %s559_s27, %s560_s28  }
  0x33   :  { %551 = dma.done.wait [#allocation3], 512  }
  0x34   :  { %552 = vsyncadd [#allocation3], 4294966784 }
  0x35   :  { %553 = dma.done.wait [#allocation6], 768  }
  0x36   :  { %554 = vsyncadd [#allocation6], 4294966528  ;;  %vm63_vm0 = vcmask 130048   ;;  %v88_v0 = vld [vmem:[#allocation7] sm:$0xff]  ;;  %v89_v1 = vld [vmem:[#allocation7 + $0x8] sm:$0xff]  ;;  %s562_s26 = smov [#allocation8]  }
  0x37   :  { %v84_v2 = vld [vmem:[#allocation2] sm:$0xff]  ;;  %v437_v3 = vpack.c.bf16 %v89_v1, %v88_v0  ;;  %v61_v5 = vld [vmem:[#allocation5 + $0x10] sm:$0xff]  ;;  %v60_v6 = vld [vmem:[#allocation5 + $0x8] sm:$0xff]  ;;  %s377_s29 = sshll.u32 %s562_s26, 4  ;;  %s378_s29 = int_to_ptr.vmem [resolvable:$true] %s377_s29 }
  0x38   :  { %417 = vmatprep.mubr.msk.f32.mxu0 %vm63_vm0, %v84_v2  ;;  %v59_v4 = vld [vmem:[#allocation5] sm:$0xff]  ;;  %v70_v8 = vsel %vm63_vm0, %v61_v5, 0.0  ;;  %v62_v9 = vld [vmem:[#allocation5 + $0x18] sm:$0xff]  ;;  %v85_v10 = vld [vmem:[#allocation2 + $0x8] sm:$0xff]  ;;  %v67_v12 = vsel %vm63_vm0, %v60_v6, 0.0  ;;  %s529_s30 = scalar_lea.vmem %s378_s29, 512  ;;  %p534_p11 = scmp.lt.s32.totalorder %s378_s29, %s378_s29 }
  0x39   :  { %438 = vmatprep.subr.bf16.mxu0 %v437_v3  ;;  %v64_v7 = vsel %vm63_vm0, %v59_v4, 0.0  ;;  %427 = vmatprep.mubr.msk.f32.mxu1 %vm63_vm0, %v59_v4  ;;  %v86_v11 = vld [vmem:[#allocation2 + $0x10] sm:$0xff]  ;;  %v73_v13 = vsel %vm63_vm0, %v62_v9, 0.0  ;;  %v87_v14 = vld [vmem:[#allocation2 + $0x18] sm:$0xff]  ;;  %v398_v38 = vld [vmem:[%s673_s3] ss:$0 sm:$0xff]  ;;  %p530_p10 = scmp.ne.s32.totalorder %s378_s29, %s529_s30  ;;  %p535_p12 = scmp.lt.s32.totalorder %s529_s30, %s529_s30 }
  0x3a   :  { %440 = vmatpush3.bf16.msra.mxu0 %v437_v3  ;;  %65 = vadd.xlane.f32.xlu0 %v64_v7 }
  0x3b   :  { %71 = vadd.xlane.f32.xlu1 %v70_v8  ;;  %p536_p13 = por %p535_p12, %p534_p11 }
  0x3d   :  { %418 = vmatmul.mubr.msk.f32.vlgmr.msra.gmra.mrb[0].mxu0 %vm63_vm0, %v85_v10  ;;  %p537_p0 = pnand %p536_p13, %p530_p10 }
  0x3e   :  { %420 = vmatprep.mubr.msk.f32.mxu0 %vm63_vm0, %v86_v11  ;;  %68 = vadd.xlane.f32.xlu0 %v67_v12 }
  0x3f   :  { %74 = vadd.xlane.f32.xlu1 %v73_v13 }
  0x41   :  { %421 = vmatmul.mubr.msk.f32.gmra.mrb[2].mxu0 %vm63_vm0, %v87_v14 }
  0xc7   :  { %v66_v15 = vpop.xlane.xlu0 %65 }
  0xc8   :  { %v72_v16 = vpop.xlane.xlu1 %71  ;;  %v76_v20 = vadd.f32 1e-05, %v66_v15 }
  0xc9   :  { %v78_v22 = vadd.f32 1e-05, %v72_v16 }
  0xcb   :  { %v69_v17 = vpop.xlane.xlu0 %68 }
  0xcc   :  { %v77_v18 = vadd.f32 1e-05, %v69_v17  ;;  %v75_v19 = vpop.xlane.xlu1 %74 }
  0xcd   :  { %v79_v21 = vadd.f32 1e-05, %v75_v19 }
  0xce   :  { %455 = vrsqrt.f32 %v77_v18 }
  0xcf   :  { %457 = vrsqrt.f32 %v76_v20 }
  0xd0   :  { %459 = vrsqrt.f32 %v79_v21 }
  0xd1   :  { %461 = vrsqrt.f32 %v78_v22 }
  0xd8   :  { %v456_v23 = vpop.eup %455 }
  0xd9   :  { %v458_v25 = vpop.eup %457 }
  0xda   :  { %v460_v28 = vpop.eup %459 }
  0xdb   :  { %v462_v32 = vpop.eup %461 }
 0x110   :  { %v419_v24 = vpop.f32.mrb[0].mxu0 }
 0x111   :  { %v188_v26 = vmul.f32 %v456_v23, %v419_v24  ;;  %v168_v27 = vpop.f32.mrb[1].mxu0 }
 0x112   :  { %v187_v29 = vmul.f32 %v458_v25, %v168_v27 }
 0x114   :  { %v422_v30 = vpop.f32.mrb[2].mxu0  ;;  %v441_v31 = vpack.c.bf16 %v188_v26, %v187_v29 }
 0x115   :  { %v190_v33 = vmul.f32 %v460_v28, %v422_v30  ;;  %v178_v34 = vpop.f32.mrb[3].mxu0 }
 0x116   :  { %v189_v35 = vmul.f32 %v462_v32, %v178_v34  ;;  %442 = vmatprep.subr.bf16.mxu1 %v441_v31 }
 0x117   :  { %444 = vmatpush3.bf16.msra.mxu1 %v441_v31 }
 0x118   :  { %v445_v36 = vpack.c.bf16 %v190_v33, %v189_v35 }
 0x11a   :  { %428 = vmatmul.mubr.msk.f32.vlgmr.msra.gmra.mrb[0].mxu1 %vm63_vm0, %v60_v6  ;;  %446 = vmatprep.subr.bf16.mxu1 %v445_v36 }
 0x11b   :  { %448 = vmatpush3.bf16.msra.mxu1 %v445_v36  ;;  %434 = vmatprep.mubr.msk.f32.mxu1 %vm63_vm0, %v61_v5 }
 0x11e   :  { %435 = vmatmul.mubr.msk.f32.vlgmr.msra.gmra.mrb[2].mxu1 %vm63_vm0, %v62_v9 }
 0x1ed   :  { %v429_v37 = vpop.f32.mrb[0].mxu1 }
 0x1ee   :  { %v354_v39 = vmul.f32 %v456_v23, %v429_v37  ;;  %v263_v40 = vpop.f32.mrb[1].mxu1 }
 0x1ef   :  { %v353_v41 = vmul.f32 %v458_v25, %v263_v40 }
 0x1f0   :  { %v365_v42 = vadd.f32 %v398_v38, %v354_v39 }
 0x1f1   :  { %v364_v43 = vadd.f32 %v398_v38, %v353_v41  ;;  %v436_v44 = vpop.f32.mrb[2].mxu1 }
 0x1f2   :  { %369 = vst [vmem:[#allocation8 + $0x8] sm:$0xff] %v365_v42  ;;  %v356_v45 = vmul.f32 %v460_v28, %v436_v44  ;;  %v344_v46 = vpop.f32.mrb[3].mxu1 }
 0x1f3   :  { %368 = vst [vmem:[#allocation8] sm:$0xff] %v364_v43  ;;  %v355_v47 = vmul.f32 %v462_v32, %v344_v46 }
 0x1f4   :  { %v367_v48 = vadd.f32 %v398_v38, %v356_v45 }
 0x1f5   :  { %v366_v49 = vadd.f32 %v398_v38, %v355_v47 }
 0x1f6   :  { %371 = vst [vmem:[#allocation8 + $0x18] sm:$0xff] %v367_v48 }
 0x1f7   :  { %370 = vst [vmem:[#allocation8 + $0x10] sm:$0xff] %v366_v49 }
 0x1f8   :  { %540 = shalt.err (!%p537_p0)
}
 0x1f9   :  { %s541_s6 = scalar_lea.hbm %s674_s4, 512 }
 0x1fa   :  { %p542_p1 = scmp.ne.s32.totalorder %s674_s4, %s541_s6  ;;  %p545_p2 = scmp.lt.u32.totalorder %s541_s6, %s674_s4 }
 0x1fc   :  { %p547_p3 = pnand %p545_p2, %p542_p1 }
 0x1fe   :  { %550 = shalt.err (!%p547_p3)
}
 0x1ff   :  { %383 = dma.vmem_to_hbm [thread:$0]  %s378_s29, 512, %s674_s4, [#allocation4], %s559_s27, %s559_s27, %s560_s28  }
 0x200   :  { %555 = dma.done.wait [#allocation4], 512  }
 0x201   :  { %556 = vsyncadd [#allocation4], 4294966784 }
 0x202   :  { %387 = vsyncpa [#allocation3], 1 }
 0x203   :  { %388 = vsyncpa [#allocation6], 1 }
 0x204   :  { %389 = vsyncpa [#allocation4], 1 }

</bundles_post_ra>
